<compile_context>
chip_gen: v6e
topology: v6e:2x2x1
jax: 0.10.0
libtpu: 0.0.40
codegen_flags: <defaults>
</compile_context>

<pallas_src>
import math
import numpy as np
import jax
import jax.numpy as jnp
from jax import lax
from jax.experimental import pallas as pl
from jax.experimental.pallas import tpu as pltpu


# ------------------------------------------------------------------------
# Matern spectral density (identical formula to the PyTorch module, with
# math.gamma standing in for scipy.special.gamma; host-side numpy only).
# ------------------------------------------------------------------------
def matern_spec_density(omega, rho, nu):
    omega = np.asarray(omega, dtype=np.float64)
    term1 = (2.0 ** 3 * np.pi ** 1.5 * math.gamma(nu + 1.5) * np.power(2.0 * nu, nu)
             / (math.gamma(nu) * np.power(rho, 2.0 * nu)))
    term2 = np.power(2.0 * nu / rho ** 2 + 4.0 * np.pi ** 2 * np.power(omega, 2.0),
                     -(nu + 1.5))
    return term1 * term2


# ------------------------------------------------------------------------
# Synthetic harmonic space: real spherical harmonics on S^2 up to degree L=3.
# harmonic_expansion(X) : (N, 3) unit vectors -> (N, 16) features.
# TODO(synk): a generic `harmonic_space` object is not available; a fixed real
#             spherical-harmonic basis up to degree 3 stands in for it.
# ------------------------------------------------------------------------
MAX_DEGREE = 3
NUM_HARMONICS = (MAX_DEGREE + 1) ** 2  # 16
HARMONIC_DEGREES = np.concatenate(
    [np.full(2 * l + 1, l, dtype=np.float64) for l in range(MAX_DEGREE + 1)]
)  # [0, 1,1,1, 2,...,2, 3,...,3], length 16


def harmonic_expansion(X):
    """Real spherical harmonics (Cartesian form) up to degree 3. X: (N, 3) unit vecs."""
    x, y, z = X[:, 0], X[:, 1], X[:, 2]
    pi = np.pi
    cols = [
        # l = 0
        jnp.full_like(x, 0.5 * math.sqrt(1.0 / pi)),
        # l = 1
        math.sqrt(3.0 / (4.0 * pi)) * y,
        math.sqrt(3.0 / (4.0 * pi)) * z,
        math.sqrt(3.0 / (4.0 * pi)) * x,
        # l = 2
        0.5 * math.sqrt(15.0 / pi) * x * y,
        0.5 * math.sqrt(15.0 / pi) * y * z,
        0.25 * math.sqrt(5.0 / pi) * (3.0 * z * z - 1.0),
        0.5 * math.sqrt(15.0 / pi) * x * z,
        0.25 * math.sqrt(15.0 / pi) * (x * x - y * y),
        # l = 3
        0.25 * math.sqrt(35.0 / (2.0 * pi)) * y * (3.0 * x * x - y * y),
        0.5 * math.sqrt(105.0 / pi) * x * y * z,
        0.25 * math.sqrt(21.0 / (2.0 * pi)) * y * (5.0 * z * z - 1.0),
        0.25 * math.sqrt(7.0 / pi) * z * (5.0 * z * z - 3.0),
        0.25 * math.sqrt(21.0 / (2.0 * pi)) * x * (5.0 * z * z - 1.0),
        0.25 * math.sqrt(105.0 / pi) * z * (x * x - y * y),
        0.25 * math.sqrt(35.0 / (2.0 * pi)) * x * (x * x - 3.0 * y * y),
    ]
    return jnp.stack(cols, axis=1).astype(jnp.float32)  # (N, 16)


# ------------------------------------------------------------------------
# Pallas kernel: one (tm, tn) output tile of  phi1 @ phi2t_scaled
#   phi1_ref  : (tm, 16) f32  -- rows of Phi(X1), resident across the j axis
#   phi2ts_ref: (16, tn) f32  -- pre-transposed, spec-scaled Phi(X2).T tile
#   out_ref   : (tm, tn)      -- lane-dense output tile (f32 or bf16)
# Transpose-free dot_general -> MXU gets its natural (K, N) RHS; f32 accumulate.
# ------------------------------------------------------------------------
def _matern_gram_kernel(phi1_ref, phi2ts_ref, out_ref):
    out_ref[...] = lax.dot_general(
        phi1_ref[...], phi2ts_ref[...],
        dimension_numbers=(((1,), (0,)), ((), ())),
        preferred_element_type=jnp.float32,
    ).astype(out_ref.dtype)


def _round_up(x, m):
    return ((x + m - 1) // m) * m


def matern_gram(phi1, phi2t_scaled, *, tm=1024, tn=2048, out_dtype=jnp.float32,
                vmem_limit_bytes=32 * 1024 * 1024, collapse_j=True):
    """phi1: (N1, M) f32, phi2t_scaled: (M, N2) f32 -> (N1, N2) out_dtype."""
    N1, M = phi1.shape
    M2, N2 = phi2t_scaled.shape
    assert M == M2

    # Lane-dense output tiles: tm multiple of 8 (16 would be needed for bf16,
    # defaults already satisfy it), tn multiple of 128; never larger than the
    # (rounded-up) problem size. Pallas masks the ragged edge tiles itself.
    tm = _round_up(max(1, min(tm, N1)), 8)
    tn = _round_up(max(1, min(tn, N2)), 128)

    # If the whole-row slab fits comfortably inside the scoped-VMEM budget
    # (double-buffered output + phi2t + phi1), collapse the j axis: one wide
    # unmasked store per i step, phi2t loaded exactly once.
    if collapse_j:
        N2p = _round_up(N2, 128)
        full_width_bytes = 2 * 4 * (tm * N2p + M * N2p + tm * M)
        if full_width_bytes <= int(0.8 * vmem_limit_bytes):
            tn = max(tn, N2p)

    grid = (pl.cdiv(N1, tm), pl.cdiv(N2, tn))  # j innermost -> phi1 tile resident

    # Advisory cost: phi2t is re-read once per i block.
    out_itemsize = np.dtype(out_dtype).itemsize
    cost = pl.CostEstimate(
        flops=2 * N1 * N2 * M,
        transcendentals=0,
        bytes_accessed=int(out_itemsize * N1 * N2
                           + 4 * N1 * M
                           + 4 * grid[0] * M * N2),
    )

    return pl.pallas_call(
        _matern_gram_kernel,
        out_shape=jax.ShapeDtypeStruct((N1, N2), out_dtype),
        grid_spec=pltpu.PrefetchScalarGridSpec(
            num_scalar_prefetch=0,
            grid=grid,
            in_specs=[
                pl.BlockSpec((tm, M), lambda i, j: (i, 0)),   # phi1: depends only on i
                pl.BlockSpec((M, tn), lambda i, j: (0, j)),   # phi2t: streams along j
            ],
            out_specs=pl.BlockSpec((tm, tn), lambda i, j: (i, j)),
        ),
        compiler_params=pltpu.CompilerParams(
            # i sharded across TensorCores (v7x megacore), j sequential per core.
            dimension_semantics=("parallel", "arbitrary"),
            vmem_limit_bytes=vmem_limit_bytes,
        ),
        cost_estimate=cost,
    )(phi1.astype(jnp.float32), phi2t_scaled.astype(jnp.float32))


# ------------------------------------------------------------------------
# Module-equivalent wrapper
# ------------------------------------------------------------------------
class SphericalMaternKernelPallas:
    def __init__(self, rho=1.0, nu=1.5):
        self.rho = rho
        self.nu = nu
        omega = np.sqrt(HARMONIC_DEGREES * (HARMONIC_DEGREES + 1.0))
        spec = matern_spec_density(omega, rho, nu).astype(np.float32)
        # Drop the l=0 harmonic by zeroing its spectral weight instead of slicing
        # (identical to Phi[:, 1:] @ SpecMat[1:, 1:] @ Phi[:, 1:].T).
        spec[0] = 0.0
        self.spec_diag = jnp.asarray(spec)  # (16,)

    def __call__(self, X1, X2, *, tm=1024, tn=2048, out_dtype=jnp.float32,
                 collapse_j=True):
        phi1 = harmonic_expansion(X1)                                   # (N1, 16)
        # Fold diag(spec) into Phi(X2) once (tiny (N2,16) elementwise pass),
        # then pre-transpose so the kernel RHS is already (K, N) lane-dense.
        phi2t_scaled = (harmonic_expansion(X2) * self.spec_diag[None, :]).T  # (16, N2)
        return matern_gram(phi1, phi2t_scaled, tm=tm, tn=tn,
                           out_dtype=out_dtype, collapse_j=collapse_j)


def _reference(X1, X2, spec_diag):
    phi1 = harmonic_expansion(X1)
    phi2 = harmonic_expansion(X2)
    return (phi1 * spec_diag[None, :]) @ phi2.T


if __name__ == "__main__":
    key = jax.random.PRNGKey(0)
    k1, k2, k3, k4, k5, k6 = jax.random.split(key, 6)

    kern = SphericalMaternKernelPallas(rho=1.0, nu=1.5)

    def unit_points(k, n):
        p = jax.random.normal(k, (n, 3), dtype=jnp.float32)
        return p / jnp.linalg.norm(p, axis=1, keepdims=True)

    # --- small demo shapes (module-scale), default tiles, collapsed j axis ---
    N1, N2 = 16, 8
    X1, X2 = unit_points(k1, N1), unit_points(k2, N2)
    K = jax.block_until_ready(kern(X1, X2))
    K_ref = _reference(X1, X2, kern.spec_diag)
    assert K.shape == (N1, N2)
    np.testing.assert_allclose(np.asarray(K), np.asarray(K_ref), rtol=1e-5, atol=1e-5)

    # --- non-multiple shapes, small explicit tiles, 2D grid with ragged edges ---
    N1b, N2b = 136, 200
    X1b, X2b = unit_points(k3, N1b), unit_points(k4, N2b)
    Kb = jax.block_until_ready(
        kern(X1b, X2b, tm=64, tn=128, collapse_j=False))   # grid = (3, 2)
    Kb_ref = _reference(X1b, X2b, kern.spec_diag)
    assert Kb.shape == (N1b, N2b)
    np.testing.assert_allclose(np.asarray(Kb), np.asarray(Kb_ref), rtol=1e-5, atol=1e-5)

    # --- moderate non-multiple shapes, default tiles (full-width j collapse) ---
    N1c, N2c = 600, 390
    X1c, X2c = unit_points(k5, N1c), unit_points(k6, N2c)
    Kc = jax.block_until_ready(kern(X1c, X2c))
    Kc_ref = _reference(X1c, X2c, kern.spec_diag)
    assert Kc.shape == (N1c, N2c)
    np.testing.assert_allclose(np.asarray(Kc), np.asarray(Kc_ref), rtol=1e-5, atol=1e-5)

    print("KERNEL_OK")
</pallas_src>

<mosaic_0001>
module attributes {stable_mosaic.version = 11 : i64} {
  func.func @_matern_gram_kernel(%arg0: i32, %arg1: i32, %arg2: memref<16x16xf32, #tpu.memory_space<vmem>>, %arg3: memref<16x128xf32, #tpu.memory_space<vmem>>, %arg4: memref<16x128xf32, #tpu.memory_space<vmem>>) attributes {dimension_semantics = [#tpu.dimension_semantics<parallel>, #tpu.dimension_semantics<arbitrary>], iteration_bounds = array<i64: 1, 1>, scalar_prefetch = 0 : i64, scratch_operands = 0 : i64, tpu.core_type = #tpu.core_type<tc>, window_params = [{transform_indices = @transform_0, window_bounds = array<i64: 16, 16>}, {transform_indices = @transform_1, window_bounds = array<i64: 16, 128>}, {transform_indices = @transform_2, window_bounds = array<i64: 16, 128>}]} {
    %c0 = arith.constant 0 : index
    %c0_0 = arith.constant 0 : index
    %0 = vector.load %arg2[%c0, %c0_0] : memref<16x16xf32, #tpu.memory_space<vmem>>, vector<16x16xf32>
    %c0_1 = arith.constant 0 : index
    %c0_2 = arith.constant 0 : index
    %1 = vector.load %arg3[%c0_1, %c0_2] : memref<16x128xf32, #tpu.memory_space<vmem>>, vector<16x128xf32>
    %cst = arith.constant dense<0.000000e+00> : vector<16x128xf32>
    %2 = tpu.matmul %0, %1, %cst {dimension_numbers = #tpu.dot_dimension_numbers<[1], [0], [0], [1], [0, 0, 1, 1], [], []>} : vector<16x16xf32>, vector<16x128xf32>, vector<16x128xf32> -> vector<16x128xf32>
    %c0_3 = arith.constant 0 : index
    %c0_4 = arith.constant 0 : index
    %3 = vector.load %arg4[%c0_3, %c0_4] : memref<16x128xf32, #tpu.memory_space<vmem>>, vector<16x128xf32>
    tpu.vector_store %arg4[%c0_3, %c0_4], %2 {strides = array<i32>} : memref<16x128xf32, #tpu.memory_space<vmem>>, vector<16x128xf32>,
    return
  }
  func.func @transform_0(%arg0: i32, %arg1: i32) -> (i32, i32) {
    %c0_i32 = arith.constant 0 : i32
    %c0_i32_0 = arith.constant 0 : i32
    return %arg0, %c0_i32 : i32, i32
  }
  func.func @transform_1(%arg0: i32, %arg1: i32) -> (i32, i32) {
    %c0_i32 = arith.constant 0 : i32
    %c0_i32_0 = arith.constant 0 : i32
    return %c0_i32, %arg1 : i32, i32
  }
  func.func @transform_2(%arg0: i32, %arg1: i32) -> (i32, i32) {
    %c0_i32 = arith.constant 0 : i32
    return %arg0, %arg1 : i32, i32
  }
}

</mosaic_0001>

<bundles_post_ra>
// kernel: tpu_custom_call.1
= control target key start
LH: loop header
LB: loop body
LE: loop exit
PB: predicated region body
PF: predicated region fallthrough
CT: control target
= control target key end

     0   :  { %vm15_vm0 = vcmask 130048   ;;  %s149_s1 = inlined_call_operand.vmem [shape: f32[16,8], index: 1, kind: input, shape index: {}]   ;;  %s150_s0 = inlined_call_operand.vmem [shape: f32[16,16], index: 0, kind: input, shape index: {}]   ;;  %s151_s2 = inlined_call_operand.vmem [shape: f32[16,8], index: 2, kind: output, shape index: {}]  }
   0x1   :  { %v14_v0 = vld [vmem:[%s149_s1 + $0x8] sm:$0xff]  ;;  %v13_v1 = vld [vmem:[%s149_s1] sm:$0xff] }
   0x2   :  { %v11_v2 = vld [vmem:[%s150_s0] sm:$0xff]  ;;  %109 = vmatprep.subr.mxu0 %v14_v0  ;;  %v12_v3 = vld [vmem:[%s150_s0 + $0x8] sm:$0xff] }
   0x3   :  { %113 = vmatprep.mubr.msk.f32.mxu0 %vm15_vm0, %v11_v2  ;;  %110 = vmatpush3.msra.mxu0 %v14_v0 }
   0x4   :  { %111 = vmatprep.subr.mxu0 %v13_v1 }
   0x5   :  { %112 = vmatpush3.msra.mxu0 %v13_v1 }
   0x6   :  { %114 = vmatmul.mubr.msk.f32.vlgmr.msra.gmra.mxu0 %vm15_vm0, %v12_v3 }
  0xc6   :  { %v115_v4 = vpop.f32.mrf.mxu0 }
  0xc7   :  { %98 = vst [vmem:[%s151_s2 + $0x8] sm:$0xff] %v115_v4 }
  0xc8   :  { %v88_v5 = vpop.f32.mrf.mxu0 }
  0xc9   :  { %97 = vst [vmem:[%s151_s2] sm:$0xff] %v88_v5 }

</bundles_post_ra>
